<compile_context>
chip_gen: v7x
topology: tpu7x:2x2x1
jax: 0.10.0
libtpu: 0.0.40
codegen_flags: <defaults>
</compile_context>

<pallas_src>
import jax
import jax.numpy as jnp
from jax.experimental import pallas as pl
from jax.experimental.pallas import tpu as pltpu

LANE = 128
SUBLANE = 8


def _round_up(x, m):
    return (x + m - 1) // m * m


def _cdiv(a, b):
    return (a + b - 1) // b


def two_layer_fc_kernel(x_ref, w1_ref, b1_ref, w2_ref, b2_ref, o_ref):
    """One batch tile x one hidden tile. The output block is the f32 accumulator."""
    hj = pl.program_id(1)

    @pl.when(hj == 0)
    def _():
        # Start the accumulator from the fc2 bias (broadcast over rows).
        o_ref[...] = jnp.broadcast_to(b2_ref[...], o_ref.shape)

    # fc1 on this hidden slice: cast x to bf16 in-kernel, MXU accumulates f32,
    # bias-add + ReLU stay f32 (v5e VPU/EUP has no bf16).
    xb = x_ref[...].astype(jnp.bfloat16)
    h = jnp.dot(xb, w1_ref[...], preferred_element_type=jnp.float32)
    h = jnp.maximum(h + b1_ref[...], 0.0)
    # fc2 partial product accumulated into the resident output block.
    o_ref[...] += jnp.dot(h.astype(jnp.bfloat16), w2_ref[...],
                          preferred_element_type=jnp.float32)


def prepare_params(w1, b1, w2, b2):
    """One-time conversion from PyTorch nn.Linear layout to kernel layout.

    w1: (hidden, input)   -> (input, hidden_pad)   bf16 (zero-padded hidden)
    b1: (hidden,)         -> (1, hidden_pad)       f32  (zero-padded)
    w2: (classes, hidden) -> (hidden_pad, out_pad) bf16 (zero-padded)
    b2: (classes,)        -> (1, out_pad)          f32  (zero-padded)
    Zero-padded hidden columns give ReLU(0 + 0) = 0 and contribute nothing to
    fc2; padded output lanes are sliced off by the wrapper.
    """
    hidden, d_in = w1.shape
    num_classes = w2.shape[0]
    hidden_pad = _round_up(hidden, LANE)
    out_pad = _round_up(num_classes, LANE)

    w1_io = jnp.zeros((d_in, hidden_pad), jnp.bfloat16)
    w1_io = w1_io.at[:, :hidden].set(w1.T.astype(jnp.bfloat16))
    b1_2d = jnp.zeros((1, hidden_pad), jnp.float32)
    b1_2d = b1_2d.at[:, :hidden].set(b1.astype(jnp.float32))

    w2_io = jnp.zeros((hidden_pad, out_pad), jnp.bfloat16)
    w2_io = w2_io.at[:hidden, :num_classes].set(w2.T.astype(jnp.bfloat16))
    b2_2d = jnp.zeros((1, out_pad), jnp.float32)
    b2_2d = b2_2d.at[:, :num_classes].set(b2.astype(jnp.float32))

    return {"w1": w1_io, "b1": b1_2d, "w2": w2_io, "b2": b2_2d,
            "num_classes": num_classes}


def _vmem_limit_bytes():
    """Per-chip VMEM limit: capacity minus headroom; conservative fallback."""
    cap = 64 * 1024 * 1024
    try:
        info = pltpu.get_tpu_info()
        cap = int(getattr(info, "vmem_capacity_bytes", cap))
    except Exception:
        pass
    return max(cap - 16 * 1024 * 1024, 16 * 1024 * 1024)


def _choose_tiles(n, d_in, hidden_pad, out_pad, budget):
    """Pick (tile_b, tile_h) from the per-chip VMEM budget."""

    def weight_bytes(tile_h):
        nbuf = 1 if tile_h == hidden_pad else 2       # Buffered(1) when resident
        return (nbuf * (d_in * tile_h * 2 + tile_h * 4 + tile_h * out_pad * 2)
                + out_pad * 4)

    def io_bytes(tile_b, tile_h):
        return (2 * tile_b * d_in * 4                 # x tile (f32, double-buffered)
                + 2 * tile_b * out_pad * 4            # output/accumulator block
                + tile_b * tile_h * 4)                # live fc1 intermediate

    # Largest hidden tile (multiple of 128 that divides hidden_pad) whose
    # weights fit next to a 128-row batch tile; hidden_pad itself => resident.
    tile_h = LANE
    for cand in range(hidden_pad, LANE - 1, -LANE):
        if hidden_pad % cand:
            continue
        if weight_bytes(cand) + io_bytes(LANE, cand) <= budget:
            tile_h = cand
            break

    # Largest batch tile that fits (prefer 512/256: fuller MXU M dim, fewer
    # ~0.35us grid steps).
    tile_b_cap = SUBLANE
    for cand in (512, 256, 128, 64, 32, 16, 8):
        if weight_bytes(tile_h) + io_bytes(cand, tile_h) <= budget:
            tile_b_cap = cand
            break

    if n <= SUBLANE:
        tile_b = SUBLANE
    elif n <= tile_b_cap:
        # Split into >=2 tiles so the "parallel" axis can feed both v7x TCs.
        tile_b = min(tile_b_cap, _round_up(_cdiv(n, 2), SUBLANE))
    else:
        tile_b = tile_b_cap
    return tile_b, tile_h


def two_layer_fc(x_nchw, params):
    """x_nchw: (N, C, H, W). Returns logits (N, num_classes) float32."""
    n = x_nchw.shape[0]
    x2d = x_nchw.reshape(n, -1)                      # flatten = view(N, -1); no cast/pad
    d_in, hidden_pad = params["w1"].shape
    out_pad = params["w2"].shape[1]
    num_classes = params["num_classes"]

    vmem_limit = _vmem_limit_bytes()
    budget = max(vmem_limit - (4 << 20), 8 << 20)
    tile_b, tile_h = _choose_tiles(n, d_in, hidden_pad, out_pad, budget)
    grid = (_cdiv(n, tile_b), hidden_pad // tile_h)
    resident = tile_h == hidden_pad

    def spec(shape, idx, const):
        if const:        # constant block index: single buffer, fetched once
            return pl.BlockSpec(shape, idx, pipeline_mode=pl.Buffered(1))
        return pl.BlockSpec(shape, idx)              # streamed: default double-buffer

    in_specs = [
        pl.BlockSpec((tile_b, d_in), lambda i, j: (i, 0)),       # x streams over batch
        spec((d_in, tile_h), lambda i, j: (0, j), resident),     # w1
        spec((1, tile_h), lambda i, j: (0, j), resident),        # b1
        spec((tile_h, out_pad), lambda i, j: (j, 0), resident),  # w2
        spec((1, out_pad), lambda i, j: (0, 0), True),           # b2 (always constant)
    ]
    out_specs = pl.BlockSpec((tile_b, out_pad), lambda i, j: (i, 0))

    nb = grid[0]
    weight_stream_bytes = (d_in * hidden_pad * 2 + hidden_pad * 4
                           + hidden_pad * out_pad * 2)
    bytes_accessed = (n * d_in * x2d.dtype.itemsize
                      + (1 if resident else nb) * weight_stream_bytes
                      + out_pad * 4
                      + n * out_pad * 4)

    out = pl.pallas_call(
        two_layer_fc_kernel,
        out_shape=jax.ShapeDtypeStruct((n, out_pad), jnp.float32),
        grid=grid,
        in_specs=in_specs,
        out_specs=out_specs,
        compiler_params=pltpu.CompilerParams(
            dimension_semantics=("parallel", "arbitrary"),
            vmem_limit_bytes=vmem_limit),
        cost_estimate=pl.CostEstimate(
            flops=2 * n * (d_in * hidden_pad + hidden_pad * out_pad),
            transcendentals=0,
            bytes_accessed=bytes_accessed),
    )(x2d, params["w1"], params["b1"], params["w2"], params["b2"])

    return out[:, :num_classes]


def init_params(key, input_size, hidden_size, num_classes):
    """Deterministic init matching TwoLayerFC.__init__ (PyTorch layout):
    kaiming_normal_ on weights (fan_in, gain=sqrt(2)), default uniform bias."""
    k1, k2, k3, k4 = jax.random.split(key, 4)
    std1 = (2.0 / input_size) ** 0.5
    w1 = std1 * jax.random.normal(k1, (hidden_size, input_size), jnp.float32)
    bound1 = 1.0 / (input_size ** 0.5)
    b1 = jax.random.uniform(k2, (hidden_size,), jnp.float32, -bound1, bound1)

    std2 = (2.0 / hidden_size) ** 0.5
    w2 = std2 * jax.random.normal(k3, (num_classes, hidden_size), jnp.float32)
    bound2 = 1.0 / (hidden_size ** 0.5)
    b2 = jax.random.uniform(k4, (num_classes,), jnp.float32, -bound2, bound2)
    return w1, b1, w2, b2


if __name__ == "__main__":
    # Small shapes: batch=2, C=4, H=W=16 -> input_size = 4*16*16 = 1024
    batch, C, H, W = 2, 4, 16, 16
    input_size = C * H * W
    hidden_size = 128
    num_classes = 10

    key = jax.random.PRNGKey(0)
    kx, kp = jax.random.split(key)
    x = jax.random.normal(kx, (batch, C, H, W), jnp.float32)
    w1, b1, w2, b2 = init_params(kp, input_size, hidden_size, num_classes)
    params = prepare_params(w1, b1, w2, b2)   # one-time layout conversion

    out = two_layer_fc(x, params)
    out = jax.block_until_ready(out)

    # Reference in plain JAX with the same bf16-operand / f32-accumulate matmuls.
    x2d = x.reshape(batch, -1)
    h_ref = jnp.maximum(
        jnp.dot(x2d.astype(jnp.bfloat16), w1.T.astype(jnp.bfloat16),
                preferred_element_type=jnp.float32) + b1, 0.0)
    ref = jnp.dot(h_ref.astype(jnp.bfloat16), w2.T.astype(jnp.bfloat16),
                  preferred_element_type=jnp.float32) + b2

    assert out.shape == (batch, num_classes)
    assert jnp.allclose(out, ref, atol=5e-2, rtol=5e-2), (
        float(jnp.max(jnp.abs(out - ref))))

    print("KERNEL_OK")
</pallas_src>

<mosaic_0001>
module attributes {stable_mosaic.version = 11 : i64} {
  func.func @two_layer_fc_kernel(%arg0: i32, %arg1: i32, %arg2: memref<8x1024xf32, #tpu.memory_space<vmem>>, %arg3: memref<1024x128xbf16, #tpu.memory_space<vmem>>, %arg4: memref<1x128xf32, #tpu.memory_space<vmem>>, %arg5: memref<128x128xbf16, #tpu.memory_space<vmem>>, %arg6: memref<1x128xf32, #tpu.memory_space<vmem>>, %arg7: memref<8x128xf32, #tpu.memory_space<vmem>>) attributes {dimension_semantics = [#tpu.dimension_semantics<parallel>, #tpu.dimension_semantics<arbitrary>], iteration_bounds = array<i64: 1, 1>, scalar_prefetch = 0 : i64, scratch_operands = 0 : i64, tpu.core_type = #tpu.core_type<tc>, window_params = [{transform_indices = @transform_0, window_bounds = array<i64: 8, 1024>}, {pipeline_mode = #tpu.pipeline_mode<synchronous>, transform_indices = @transform_1, window_bounds = array<i64: 1024, 128>}, {pipeline_mode = #tpu.pipeline_mode<synchronous>, transform_indices = @transform_2, window_bounds = array<i64: 1, 128>}, {pipeline_mode = #tpu.pipeline_mode<synchronous>, transform_indices = @transform_3, window_bounds = array<i64: 128, 128>}, {pipeline_mode = #tpu.pipeline_mode<synchronous>, transform_indices = @transform_4, window_bounds = array<i64: 1, 128>}, {transform_indices = @transform_5, window_bounds = array<i64: 8, 128>}]} {
    %c0_i32 = arith.constant 0 : i32
    %0 = arith.cmpi eq, %arg1, %c0_i32 : i32
    %1 = arith.extui %0 : i1 to i32
    %c0_i32_0 = arith.constant 0 : i32
    %2 = arith.cmpi ne, %1, %c0_i32_0 : i32
    scf.if %2 {
      %c0_14 = arith.constant 0 : index
      %c0_15 = arith.constant 0 : index
      %18 = vector.load %arg6[%c0_14, %c0_15] : memref<1x128xf32, #tpu.memory_space<vmem>>, vector<1x128xf32>
      %19 = vector.shape_cast %18 : vector<1x128xf32> to vector<1x128xf32>
      %20 = vector.broadcast %19 : vector<1x128xf32> to vector<8x128xf32>
      %c0_16 = arith.constant 0 : index
      %c0_17 = arith.constant 0 : index
      %21 = vector.load %arg7[%c0_16, %c0_17] : memref<8x128xf32, #tpu.memory_space<vmem>>, vector<8x128xf32>
      tpu.vector_store %arg7[%c0_16, %c0_17], %20 {strides = array<i32>} : memref<8x128xf32, #tpu.memory_space<vmem>>, vector<8x128xf32>,
    } else {
    }
    %c0 = arith.constant 0 : index
    %c0_1 = arith.constant 0 : index
    %3 = vector.load %arg2[%c0, %c0_1] : memref<8x1024xf32, #tpu.memory_space<vmem>>, vector<8x1024xf32>
    %4 = arith.truncf %3 : vector<8x1024xf32> to vector<8x1024xbf16>
    %c0_2 = arith.constant 0 : index
    %c0_3 = arith.constant 0 : index
    %5 = vector.load %arg3[%c0_2, %c0_3] : memref<1024x128xbf16, #tpu.memory_space<vmem>>, vector<1024x128xbf16>
    %cst = arith.constant dense<0.000000e+00> : vector<8x128xf32>
    %6 = tpu.matmul %4, %5, %cst {dimension_numbers = #tpu.dot_dimension_numbers<[1], [0], [0], [1], [0, 0, 1, 1], [], []>} : vector<8x1024xbf16>, vector<1024x128xbf16>, vector<8x128xf32> -> vector<8x128xf32>
    %c0_4 = arith.constant 0 : index
    %c0_5 = arith.constant 0 : index
    %7 = vector.load %arg4[%c0_4, %c0_5] : memref<1x128xf32, #tpu.memory_space<vmem>>, vector<1x128xf32>
    %8 = vector.broadcast %7 : vector<1x128xf32> to vector<8x128xf32>
    %9 = arith.addf %6, %8 : vector<8x128xf32>
    %cst_6 = arith.constant 0.000000e+00 : f32
    %10 = vector.broadcast %cst_6 : f32 to vector<8x128xf32>
    %11 = arith.maximumf %9, %10 : vector<8x128xf32>
    %c0_7 = arith.constant 0 : index
    %c0_8 = arith.constant 0 : index
    %12 = vector.load %arg7[%c0_7, %c0_8] : memref<8x128xf32, #tpu.memory_space<vmem>>, vector<8x128xf32>
    %13 = arith.truncf %11 : vector<8x128xf32> to vector<8x128xbf16>
    %c0_9 = arith.constant 0 : index
    %c0_10 = arith.constant 0 : index
    %14 = vector.load %arg5[%c0_9, %c0_10] : memref<128x128xbf16, #tpu.memory_space<vmem>>, vector<128x128xbf16>
    %cst_11 = arith.constant dense<0.000000e+00> : vector<8x128xf32>
    %15 = tpu.matmul %13, %14, %cst_11 {dimension_numbers = #tpu.dot_dimension_numbers<[1], [0], [0], [1], [0, 0, 1, 1], [], []>} : vector<8x128xbf16>, vector<128x128xbf16>, vector<8x128xf32> -> vector<8x128xf32>
    %16 = arith.addf %12, %15 : vector<8x128xf32>
    %c0_12 = arith.constant 0 : index
    %c0_13 = arith.constant 0 : index
    %17 = vector.load %arg7[%c0_12, %c0_13] : memref<8x128xf32, #tpu.memory_space<vmem>>, vector<8x128xf32>
    tpu.vector_store %arg7[%c0_12, %c0_13], %16 {strides = array<i32>} : memref<8x128xf32, #tpu.memory_space<vmem>>, vector<8x128xf32>,
    return
  }
  func.func @transform_0(%arg0: i32, %arg1: i32) -> (i32, i32) {
    %c0_i32 = arith.constant 0 : i32
    %c0_i32_0 = arith.constant 0 : i32
    return %arg0, %c0_i32 : i32, i32
  }
  func.func @transform_1(%arg0: i32, %arg1: i32) -> (i32, i32) {
    %c0_i32 = arith.constant 0 : i32
    %c0_i32_0 = arith.constant 0 : i32
    return %c0_i32, %arg1 : i32, i32
  }
  func.func @transform_2(%arg0: i32, %arg1: i32) -> (i32, i32) {
    %c0_i32 = arith.constant 0 : i32
    %c0_i32_0 = arith.constant 0 : i32
    return %c0_i32, %arg1 : i32, i32
  }
  func.func @transform_3(%arg0: i32, %arg1: i32) -> (i32, i32) {
    %c0_i32 = arith.constant 0 : i32
    %c0_i32_0 = arith.constant 0 : i32
    return %arg1, %c0_i32 : i32, i32
  }
  func.func @transform_4(%arg0: i32, %arg1: i32) -> (i32, i32) {
    %c0_i32 = arith.constant 0 : i32
    %c0_i32_0 = arith.constant 0 : i32
    %c0_i32_1 = arith.constant 0 : i32
    return %c0_i32, %c0_i32_0 : i32, i32
  }
  func.func @transform_5(%arg0: i32, %arg1: i32) -> (i32, i32) {
    %c0_i32 = arith.constant 0 : i32
    %c0_i32_0 = arith.constant 0 : i32
    return %arg0, %c0_i32 : i32, i32
  }
}

</mosaic_0001>

<bundles_post_ra>
// kernel: tpu_custom_call.1
= control target key start
LH: loop header
LB: loop body
LE: loop exit
PB: predicated region body
PF: predicated region fallthrough
CT: control target
= control target key end

     0   :  { %10 = vsyncpa [#allocation3], 0  ;;  %s1480_s0 = inlined_call_operand.hbm [shape: f32[2,1024], index: 0, kind: input, shape index: {}]   ;;  %s1481_s1 = inlined_call_operand.hbm [shape: bf16[1024,128], index: 1, kind: input, shape index: {}]   ;;  %s1482_s2 = inlined_call_operand.vmem [shape: f32[1,128], index: 2, kind: input, shape index: {}]   ;;  %s1483_s3 = inlined_call_operand.hbm [shape: bf16[128,128], index: 3, kind: input, shape index: {}]   ;;  %s1484_s4 = inlined_call_operand.vmem [shape: f32[1,128], index: 4, kind: input, shape index: {}]   ;;  %s1485_s5 = inlined_call_operand.hbm [shape: f32[2,128], index: 5, kind: output, shape index: {}]  }
   0x1   :  { %11 = vsyncpa [#allocation6], 0 }
   0x2   :  { %12 = vsyncpa [#allocation4], 0 }
   0x3   :  { %17 = vsyncadd [#allocation3], 768  ;;  %s1367_s18 = smov [#allocation5]   ;;  %s1273_s22 = scalar_lea.hbm %s1481_s1, 8192 }
   0x4   :  { %s30_s19 = sshll.u32 %s1367_s18, 4  ;;  %p1274_p0 = scmp.ne.s32.totalorder %s1481_s1, %s1273_s22  ;;  %s31_s19 = int_to_ptr.vmem [resolvable:$true] %s30_s19 }
   0x5   :  { %p1277_p1 = scmp.lt.u32.totalorder %s1273_s22, %s1481_s1 }
   0x7   :  { %p1279_p2 = pnand %p1277_p1, %p1274_p0 }
   0x9   :  { %1282 = shalt.err (!%p1279_p2)
}
   0xa   :  { %s1283_s27 = scalar_lea.vmem %s31_s19, 8192  ;;  %p1288_p4 = scmp.lt.s32.totalorder %s31_s19, %s31_s19 }
   0xb   :  { %p1284_p3 = scmp.ne.s32.totalorder %s31_s19, %s1283_s27  ;;  %p1289_p5 = scmp.lt.s32.totalorder %s1283_s27, %s1283_s27 }
   0xd   :  { %p1290_p6 = por %p1289_p5, %p1288_p4 }
   0xf   :  { %p1291_p7 = pnand %p1290_p6, %p1284_p3 }
  0x11   :  { %1294 = shalt.err (!%p1291_p7)
}
  0x12   :  { %s1368_s28 = smov 64   ;;  %s1369_s29 = smov 4  }
  0x13   :  { %36 = dma.hbm_to_vmem [thread:$0]  %s1481_s1, 8192, %s31_s19, [#allocation6], %s1368_s28, %s1368_s28, %s1369_s29  }
  0x14   :  { %s1370_s7 = smov [#allocation2]   ;;  %s1295_s11 = scalar_lea.hbm %s1480_s0, 256 }
  0x15   :  { %s18_s8 = sshll.u32 %s1370_s7, 4  ;;  %p1296_p8 = scmp.ne.s32.totalorder %s1480_s0, %s1295_s11  ;;  %s19_s8 = int_to_ptr.vmem [resolvable:$true] %s18_s8 }
  0x16   :  { %p1299_p9 = scmp.lt.u32.totalorder %s1295_s11, %s1480_s0 }
  0x18   :  { %p1301_p10 = pnand %p1299_p9, %p1296_p8 }
  0x1a   :  { %1304 = shalt.err (!%p1301_p10)
}
  0x1b   :  { %s1305_s16 = scalar_lea.vmem %s19_s8, 256  ;;  %s1309_s1 = scalar_lea.vmem %s19_s8, 1024 }
  0x1c   :  { %p1306_p11 = scmp.ne.s32.totalorder %s19_s8, %s1305_s16  ;;  %p1310_p12 = scmp.lt.s32.totalorder %s19_s8, %s19_s8 }
  0x1d   :  { %p1311_p13 = scmp.lt.s32.totalorder %s1309_s1, %s1305_s16 }
  0x1f   :  { %p1312_p0 = por %p1311_p13, %p1310_p12 }
  0x21   :  { %p1313_p1 = pnand %p1312_p0, %p1306_p11 }
  0x23   :  { %1316 = shalt.err (!%p1313_p1)
}
  0x24   :  { %s1371_s17 = smov 256   ;;  %s1372_s18 = smov 16  }
  0x25   :  { %24 = dma.hbm_to_vmem [thread:$0]  %s1480_s0, 256, %s19_s8, [#allocation3], %s1371_s17, %s1371_s17, %s1372_s18  }
  0x26   :  { %s1373_s21 = smov [#allocation7]   ;;  %s1317_s25 = scalar_lea.hbm %s1483_s3, 1024 }
  0x27   :  { %s44_s22 = sshll.u32 %s1373_s21, 4  ;;  %p1318_p2 = scmp.ne.s32.totalorder %s1483_s3, %s1317_s25  ;;  %s45_s22 = int_to_ptr.vmem [resolvable:$true] %s44_s22 }
  0x28   :  { %p1321_p3 = scmp.lt.u32.totalorder %s1317_s25, %s1483_s3 }
  0x2a   :  { %p1323_p4 = pnand %p1321_p3, %p1318_p2 }
  0x2c   :  { %1326 = shalt.err (!%p1323_p4)
}
  0x2d   :  { %s1327_s7 = scalar_lea.vmem %s45_s22, 1024  ;;  %p1332_p6 = scmp.lt.s32.totalorder %s45_s22, %s45_s22 }
  0x2e   :  { %p1328_p5 = scmp.ne.s32.totalorder %s45_s22, %s1327_s7  ;;  %p1333_p7 = scmp.lt.s32.totalorder %s1327_s7, %s1327_s7 }
  0x30   :  { %p1334_p8 = por %p1333_p7, %p1332_p6 }
  0x32   :  { %p1335_p9 = pnand %p1334_p8, %p1328_p5 }
  0x34   :  { %1338 = shalt.err (!%p1335_p9)
}
  0x35   :  { %50 = dma.hbm_to_vmem [thread:$0]  %s1483_s3, 1024, %s45_s22, [#allocation6], %s1368_s28, %s1368_s28, %s1369_s29  }
  0x36   :  { %1361 = dma.done.wait [#allocation3], 1024  }
  0x37   :  { %1362 = vsyncadd [#allocation3], 4294966272 }
  0x38   :  { %1363 = dma.done.wait [#allocation6], 9216  }
  0x39   :  { %1364 = vsyncadd [#allocation6], 4294958080  ;;  %v1189_v0 = vld [vmem:[#allocation5 + $0x40] sm:$0xff]   ;;  %v1193_v4 = vld [vmem:[#allocation5 + $0x48] sm:$0xff]   ;;  %v1374_v24 = vmov 1983009808   ;;  %v98_v26 = vlaneseq }
  0x3a   :  { %v1190_v1 = vld [vmem:[#allocation5 + $0xc0] sm:$0xff]   ;;  %1059 = vmatprep.subr.bf16.mxu0 %v1189_v0  ;;  %v1194_v5 = vld [vmem:[#allocation5 + $0xc8] sm:$0xff]   ;;  %v1197_v8 = vld [vmem:[#allocation5 + $0x50] sm:$0xff]   ;;  %v96_v25 = vunpack.c.l.s4 %v1374_v24  ;;  %vm1376_vm0 = vmmov 0  }
  0x3b   :  { %v1191_v2 = vld [vmem:[#allocation5] sm:$0xff]   ;;  %1081 = vmatprep.subr.bf16.mxu1 %v1190_v1  ;;  %v1195_v6 = vld [vmem:[#allocation5 + $0x8] sm:$0xff]   ;;  %v1198_v9 = vld [vmem:[#allocation5 + $0xd0] sm:$0xff]   ;;  %v99_v32 = vshrl.u32 %v98_v26, 7 }
  0x3c   :  { %v1192_v3 = vld [vmem:[#allocation5 + $0x80] sm:$0xff]   ;;  %1060 = vmatpush3.bf16.msra.mxu0 %v1191_v2  ;;  %v1196_v7 = vld [vmem:[#allocation5 + $0x88] sm:$0xff]   ;;  %v1199_v10 = vld [vmem:[#allocation5 + $0x10] sm:$0xff]   ;;  %v97_v31 = vunpack.c.0.s8 %v96_v25 }
  0x3d   :  { %1082 = vmatpush3.bf16.msra.mxu1 %v1192_v3  ;;  %1061 = vmatprep.subr.bf16.mxu0 %v1193_v4  ;;  %v1200_v11 = vld [vmem:[#allocation5 + $0x90] sm:$0xff]   ;;  %v1201_v12 = vld [vmem:[#allocation5 + $0x58] sm:$0xff]   ;;  %v1205_v16 = vld [vmem:[#allocation5 + $0x60] sm:$0xff]  }
  0x3e   :  { %1083 = vmatprep.subr.bf16.mxu1 %v1194_v5  ;;  %v1202_v13 = vld [vmem:[#allocation5 + $0xd8] sm:$0xff]   ;;  %v1206_v17 = vld [vmem:[#allocation5 + $0xe0] sm:$0xff]   ;;  %v1209_v20 = vld [vmem:[#allocation5 + $0x68] sm:$0xff]   ;;  %v1452_v37 = vsub.s32 %v97_v31, %v99_v32 }
  0x3f   :  { %v1203_v14 = vld [vmem:[#allocation5 + $0x18] sm:$0xff]   ;;  %v1207_v18 = vld [vmem:[#allocation5 + $0x20] sm:$0xff]   ;;  %v1210_v21 = vld [vmem:[#allocation5 + $0xe8] sm:$0xff]  }
  0x40   :  { %1062 = vmatpush3.bf16.msra.mxu0 %v1195_v6  ;;  %v1204_v15 = vld [vmem:[#allocation5 + $0x98] sm:$0xff]   ;;  %v1208_v19 = vld [vmem:[#allocation5 + $0xa0] sm:$0xff]   ;;  %v1211_v22 = vld [vmem:[#allocation5 + $0x28] sm:$0xff]  }
  0x41   :  { %1084 = vmatpush3.bf16.msra.mxu1 %v1196_v7  ;;  %1063 = vmatprep.subr.bf16.mxu0 %v1197_v8  ;;  %v1212_v23 = vld [vmem:[#allocation5 + $0xa8] sm:$0xff]   ;;  %v1213_v27 = vld [vmem:[#allocation5 + $0x70] sm:$0xff]   ;;  %v1217_v33 = vld [vmem:[#allocation5 + $0x78] sm:$0xff]  }
  0x42   :  { %1085 = vmatprep.subr.bf16.mxu1 %v1198_v9  ;;  %v1214_v28 = vld [vmem:[#allocation5 + $0xf0] sm:$0xff]   ;;  %v1218_v34 = vld [vmem:[#allocation5 + $0xf8] sm:$0xff]   ;;  %v1227_v44 = vld [vmem:[#allocation5 + $0x140] sm:$0xff]  }
  0x43   :  { %v1215_v29 = vld [vmem:[#allocation5 + $0x30] sm:$0xff]   ;;  %v1219_v35 = vld [vmem:[#allocation5 + $0x38] sm:$0xff]   ;;  %v1228_v47 = vld [vmem:[#allocation5 + $0x1c0] sm:$0xff]  }
  0x44   :  { %1064 = vmatpush3.bf16.msra.mxu0 %v1199_v10  ;;  %v1216_v30 = vld [vmem:[#allocation5 + $0xb0] sm:$0xff]   ;;  %v1220_v36 = vld [vmem:[#allocation5 + $0xb8] sm:$0xff]   ;;  %v1229_v50 = vld [vmem:[#allocation5 + $0x100] sm:$0xff]  }
  0x45   :  { %1086 = vmatpush3.bf16.msra.mxu1 %v1200_v11  ;;  %1065 = vmatprep.subr.bf16.mxu0 %v1201_v12  ;;  %v1221_v38 = vld [vmem:[#allocation2] ss:$16 sps:$4 sm:$0xff]   ;;  %v1225_v40 = vld [vmem:[#allocation2 + $0x4] ss:$16 sps:$4 sm:$0xff]   ;;  %v1231_v56 = vld [vmem:[#allocation5 + $0x148] sm:$0xff]  }
  0x46   :  { %1087 = vmatprep.subr.bf16.mxu1 %v1202_v13  ;;  %v1223_v39 = vld [vmem:[#allocation2 + $0x20] ss:$16 sps:$4 sm:$0xff]   ;;  %v1226_v41 = vld [vmem:[#allocation2 + $0x24] ss:$16 sps:$4 sm:$0xff]   ;;  %v101_v42 = vrot.slane %v1221_v38, %v1452_v37  ;;  %v108_v45 = vrot.slane %v1225_v40, %v1452_v37  ;;  %v1232_v59 = vld [vmem:[#allocation5 + $0x1c8] sm:$0xff]   ;;  %v1375_v40 = vmov 0.0  }
  0x47   :  { %v115_v43 = vrot.slane %v1223_v39, %v1452_v37  ;;  %v122_v46 = vrot.slane %v1226_v41, %v1452_v37  ;;  %v1230_v53 = vld [vmem:[#allocation5 + $0x180] sm:$0xff]   ;;  %v1233_v60 = vld [vmem:[#allocation5 + $0x108] sm:$0xff]   ;;  %v1235_v62 = vld [vmem:[#allocation5 + $0x150] sm:$0xff]  }
  0x48   :  { %1066 = vmatpush3.bf16.msra.mxu0 %v1203_v14  ;;  %v1234_v61 = vld [vmem:[#allocation5 + $0x188] sm:$0xff]   ;;  %v1236_v63 = vld [vmem:[#allocation5 + $0x1d0] sm:$0xff]   ;;  %v1239_v2 = vld [vmem:[#allocation5 + $0x158] sm:$0xff]  }
  0x49   :  { %1088 = vmatpush3.bf16.msra.mxu1 %v1204_v15  ;;  %1067 = vmatprep.subr.bf16.mxu0 %v1205_v16  ;;  %v124_v48 = vcombine.high %v101_v42, %v115_v43  ;;  %v123_v49 = vcombine.low %v101_v42, %v115_v43  ;;  %v126_v51 = vcombine.high %v108_v45, %v122_v46  ;;  %v1237_v0 = vld [vmem:[#allocation5 + $0x110] sm:$0xff]   ;;  %v1240_v3 = vld [vmem:[#allocation5 + $0x1d8] sm:$0xff]   ;;  %v1243_v6 = vld [vmem:[#allocation5 + $0x160] sm:$0xff]  }
  0x4a   :  { %1089 = vmatprep.subr.bf16.mxu1 %v1206_v17  ;;  %v125_v52 = vcombine.low %v108_v45, %v122_v46  ;;  %v1238_v1 = vld [vmem:[#allocation5 + $0x190] sm:$0xff]   ;;  %v1241_v4 = vld [vmem:[#allocation5 + $0x118] sm:$0xff]   ;;  %v1244_v7 = vld [vmem:[#allocation5 + $0x1e0] sm:$0xff]  }
  0x4b   :  { %v172_v54 = vpack.c.bf16 %v124_v48, %v124_v48  ;;  %v171_v55 = vpack.c.bf16 %v123_v49, %v123_v49  ;;  %v174_v57 = vpack.c.bf16 %v126_v51, %v126_v51  ;;  %v1242_v5 = vld [vmem:[#allocation5 + $0x198] sm:$0xff]   ;;  %v1245_v8 = vld [vmem:[#allocation5 + $0x120] sm:$0xff]   ;;  %v1247_v10 = vld [vmem:[#allocation5 + $0x168] sm:$0xff]  }
  0x4c   :  { %1068 = vmatpush3.bf16.msra.mxu0 %v1207_v18  ;;  %v173_v58 = vpack.c.bf16 %v125_v52, %v125_v52  ;;  %v1246_v9 = vld [vmem:[#allocation5 + $0x1a0] sm:$0xff]   ;;  %v1248_v11 = vld [vmem:[#allocation5 + $0x1e8] sm:$0xff]   ;;  %v1251_v14 = vld [vmem:[#allocation5 + $0x170] sm:$0xff]  }
  0x4d   :  { %1090 = vmatpush3.bf16.msra.mxu1 %v1208_v19  ;;  %1069 = vmatprep.subr.bf16.mxu0 %v1209_v20  ;;  %v1249_v12 = vld [vmem:[#allocation5 + $0x128] sm:$0xff]   ;;  %v1252_v15 = vld [vmem:[#allocation5 + $0x1f0] sm:$0xff]   ;;  %v1255_v18 = vld [vmem:[#allocation5 + $0x178] sm:$0xff]  }
  0x4e   :  { %1091 = vmatprep.subr.bf16.mxu1 %v1210_v21  ;;  %730 = vmatprep.mubr.bf16.mxu0 %v172_v54  ;;  %v1250_v13 = vld [vmem:[#allocation5 + $0x1a8] sm:$0xff]   ;;  %v1253_v16 = vld [vmem:[#allocation5 + $0x130] sm:$0xff]   ;;  %v1256_v19 = vld [vmem:[#allocation5 + $0x1f8] sm:$0xff]  }
  0x4f   :  { %770 = vmatprep.mubr.bf16.mxu1 %v174_v57  ;;  %v1254_v17 = vld [vmem:[#allocation5 + $0x1b0] sm:$0xff]   ;;  %v1257_v20 = vld [vmem:[#allocation5 + $0x138] sm:$0xff]   ;;  %v1265_v39 = vld [vmem:[#allocation7] sm:$0xff]  }
  0x50   :  { %1070 = vmatpush3.bf16.msra.mxu0 %v1211_v22  ;;  %v1258_v21 = vld [vmem:[#allocation5 + $0x1b8] sm:$0xff]   ;;  %v1266_v41 = vld [vmem:[#allocation7 + $0x8] sm:$0xff]   ;;  %v1269_v43 = vld [vmem:[#allocation7 + $0x20] sm:$0xff]  }
  0x51   :  { %1092 = vmatpush3.bf16.msra.mxu1 %v1212_v23  ;;  %1071 = vmatprep.subr.bf16.mxu0 %v1213_v27  ;;  %v1259_v22 = vld [vmem:[#allocation2 + $0x8] ss:$16 sps:$4 sm:$0xff]   ;;  %v1263_v24 = vld [vmem:[#allocation2 + $0xc] ss:$16 sps:$4 sm:$0xff]   ;;  %v1271_v45 = vld [vmem:[#allocation7 + $0x30] sm:$0xff]  }
  0x52   :  { %1093 = vmatprep.subr.bf16.mxu1 %v1214_v28  ;;  %v1261_v23 = vld [vmem:[#allocation2 + $0x28] ss:$16 sps:$4 sm:$0xff]   ;;  %v1264_v25 = vld [vmem:[#allocation2 + $0x2c] ss:$16 sps:$4 sm:$0xff]   ;;  %v137_v26 = vrot.slane %v1259_v22, %v1452_v37  ;;  %v144_v28 = vrot.slane %v1263_v24, %v1452_v37  ;;  %v986_v49 = vld [vmem:[%s1482_s2] ss:$0 sm:$0xff] }
  0x53   :  { %v151_v27 = vrot.slane %v1261_v23, %v1452_v37  ;;  %v1268_v42 = vld [vmem:[#allocation7 + $0x18] sm:$0xff]  }
  0x54   :  { %1072 = vmatpush3.bf16.msra.mxu0 %v1215_v29  ;;  %v158_v29 = vrot.slane %v1264_v25, %v1452_v37  ;;  %v1267_v37 = vld [vmem:[#allocation7 + $0x10] sm:$0xff]   ;;  %v1272_v46 = vld [vmem:[#allocation7 + $0x38] sm:$0xff]  }
  0x55   :  { %1094 = vmatpush3.bf16.msra.mxu1 %v1216_v30  ;;  %1073 = vmatprep.subr.bf16.mxu0 %v1217_v33  ;;  %v160_v30 = vcombine.high %v137_v26, %v151_v27  ;;  %v159_v31 = vcombine.low %v137_v26, %v151_v27 }
  0x56   :  { %1095 = vmatprep.subr.bf16.mxu1 %v1218_v34  ;;  %v162_v32 = vcombine.high %v144_v28, %v158_v29  ;;  %v161_v33 = vcombine.low %v144_v28, %v158_v29 }
  0x57   :  { %v176_v34 = vpack.c.bf16 %v160_v30, %v160_v30 }
  0x58   :  { %1074 = vmatpush3.bf16.msra.mxu0 %v1219_v35  ;;  %v175_v35 = vpack.c.bf16 %v159_v31, %v159_v31  ;;  %v177_v38 = vpack.c.bf16 %v161_v33, %v161_v33 }
  0x59   :  { %1096 = vmatpush3.bf16.msra.mxu1 %v1220_v36  ;;  %1103 = vmatprep.subr.bf16.mxu0 %v1227_v44  ;;  %v178_v36 = vpack.c.bf16 %v162_v32, %v162_v32  ;;  %v1270_v44 = vld [vmem:[#allocation7 + $0x28] sm:$0xff]  }
  0x5a   :  { %1125 = vmatprep.subr.bf16.mxu1 %v1228_v47 }
  0x5b   :  { %731 = vmatmul.mubr.bf16.vlgmr.msra.gmra.mrb[0].mxu0 %v171_v55 }
  0x5c   :  { %771 = vmatmul.mubr.bf16.vlgmr.msra.gmra.mrb[0].mxu1 %v173_v58  ;;  %1104 = vmatpush3.bf16.msra.mxu0 %v1229_v50 }
  0x5d   :  { %1126 = vmatpush3.bf16.msra.mxu1 %v1230_v53  ;;  %1105 = vmatprep.subr.bf16.mxu0 %v1231_v56 }
  0x5e   :  { %1127 = vmatprep.subr.bf16.mxu1 %v1232_v59  ;;  %810 = vmatprep.mubr.bf16.mxu0 %v176_v34 }
  0x5f   :  { %850 = vmatprep.mubr.bf16.mxu1 %v178_v36 }
  0x60   :  { %1106 = vmatpush3.bf16.msra.mxu0 %v1233_v60 }
  0x61   :  { %1128 = vmatpush3.bf16.msra.mxu1 %v1234_v61  ;;  %1107 = vmatprep.subr.bf16.mxu0 %v1235_v62 }
  0x62   :  { %1129 = vmatprep.subr.bf16.mxu1 %v1236_v63 }
  0x64   :  { %1108 = vmatpush3.bf16.msra.mxu0 %v1237_v0 }
  0x65   :  { %1130 = vmatpush3.bf16.msra.mxu1 %v1238_v1  ;;  %1109 = vmatprep.subr.bf16.mxu0 %v1239_v2 }
  0x66   :  { %1131 = vmatprep.subr.bf16.mxu1 %v1240_v3 }
  0x68   :  { %1110 = vmatpush3.bf16.msra.mxu0 %v1241_v4 }
  0x69   :  { %1132 = vmatpush3.bf16.msra.mxu1 %v1242_v5  ;;  %1111 = vmatprep.subr.bf16.mxu0 %v1243_v6 }
  0x6a   :  { %1133 = vmatprep.subr.bf16.mxu1 %v1244_v7 }
  0x6c   :  { %1112 = vmatpush3.bf16.msra.mxu0 %v1245_v8 }
  0x6d   :  { %1134 = vmatpush3.bf16.msra.mxu1 %v1246_v9  ;;  %1113 = vmatprep.subr.bf16.mxu0 %v1247_v10  ;;  %v985_v10 = vld [vmem:[%s1484_s4] ss:$0 sm:$0xff] }
  0x6e   :  { %1135 = vmatprep.subr.bf16.mxu1 %v1248_v11 }
  0x70   :  { %1114 = vmatpush3.bf16.msra.mxu0 %v1249_v12 }
  0x71   :  { %1136 = vmatpush3.bf16.msra.mxu1 %v1250_v13  ;;  %1115 = vmatprep.subr.bf16.mxu0 %v1251_v14 }
  0x72   :  { %1137 = vmatprep.subr.bf16.mxu1 %v1252_v15 }
  0x74   :  { %1116 = vmatpush3.bf16.msra.mxu0 %v1253_v16 }
  0x75   :  { %1138 = vmatpush3.bf16.msra.mxu1 %v1254_v17  ;;  %1117 = vmatprep.subr.bf16.mxu0 %v1255_v18 }
  0x76   :  { %1139 = vmatprep.subr.bf16.mxu1 %v1256_v19 }
  0x78   :  { %1118 = vmatpush3.bf16.msra.mxu0 %v1257_v20 }
  0x79   :  { %1140 = vmatpush3.bf16.msra.mxu1 %v1258_v21  ;;  %1156 = vmatprep.subr.bf16.mxu0 %v1375_v40 }
  0x7b   :  { %811 = vmatmul.mubr.bf16.vlgmr.msra.gmra.mrb[4].mxu0 %v175_v35 }
  0x7c   :  { %851 = vmatmul.mubr.bf16.vlgmr.msra.gmra.mrb[4].mxu1 %v177_v38  ;;  %1157 = vmatpush3.bf16.msra.mxu0 %v1265_v39 }
  0x7d   :  { %1158 = vmatprep.subr.bf16.mxu0 %v1375_v40  ;;  %1172 = vmatprep.mubr.msk.bf16.mxu0 %vm1376_vm0, %v1375_v40 }
  0x80   :  { %1159 = vmatpush3.bf16.msra.mxu0 %v1266_v41 }
  0x81   :  { %1160 = vmatprep.subr.bf16.mxu0 %v1375_v40 }
  0x84   :  { %1161 = vmatpush3.bf16.msra.mxu0 %v1267_v37 }
  0x85   :  { %1162 = vmatprep.subr.bf16.mxu0 %v1375_v40 }
  0x88   :  { %1163 = vmatpush3.bf16.msra.mxu0 %v1268_v42 }
  0x89   :  { %1164 = vmatprep.subr.bf16.mxu0 %v1375_v40 }
  0x8c   :  { %1165 = vmatpush3.bf16.msra.mxu0 %v1269_v43 }
  0x8d   :  { %1166 = vmatprep.subr.bf16.mxu0 %v1375_v40 }
  0x90   :  { %1167 = vmatpush3.bf16.msra.mxu0 %v1270_v44 }
  0x91   :  { %1168 = vmatprep.subr.bf16.mxu0 %v1375_v40 }
  0x94   :  { %1169 = vmatpush3.bf16.msra.mxu0 %v1271_v45 }
  0x95   :  { %1170 = vmatprep.subr.bf16.mxu0 %v1375_v40 }
  0x98   :  { %1171 = vmatpush3.bf16.msra.mxu0 %v1272_v46 }
 0x12e   :  { %v1075_v47 = vpop.f32.mrb[0].mxu0 }
 0x12f   :  { %v1097_v48 = vpop.f32.mrb[0].mxu1  ;;  %v1076_v50 = vpop.f32.mrb[1].mxu0 }
 0x130   :  { %v1077_v51 = vadd.f32 %v1076_v50, %v1075_v47  ;;  %v1098_v52 = vpop.f32.mrb[1].mxu1  ;;  %v1078_v53 = vpop.f32.mrb[2].mxu0 }
 0x131   :  { %v1099_v54 = vadd.f32 %v1098_v52, %v1097_v48  ;;  %v1100_v55 = vpop.f32.mrb[2].mxu1  ;;  %v1079_v56 = vpop.f32.mrb[3].mxu0 }
 0x132   :  { %v733_v57 = vadd.f32 %v1077_v51, %v986_v49  ;;  %v1101_v58 = vpop.f32.mrb[3].mxu1 }
 0x134   :  { %v773_v59 = vadd.f32 %v1099_v54, %v733_v57 }
 0x14e   :  { %v1119_v60 = vpop.f32.mrb[4].mxu0 }
 0x14f   :  { %v1141_v61 = vpop.f32.mrb[4].mxu1  ;;  %v1120_v62 = vpop.f32.mrb[5].mxu0 }
 0x150   :  { %v1121_v63 = vadd.f32 %v1120_v62, %v1119_v60  ;;  %v1142_v0 = vpop.f32.mrb[5].mxu1  ;;  %v1122_v1 = vpop.f32.mrb[6].mxu0 }
 0x151   :  { %v1143_v2 = vadd.f32 %v1142_v0, %v1141_v61  ;;  %v1144_v3 = vpop.f32.mrb[6].mxu1  ;;  %v1123_v4 = vpop.f32.mrb[7].mxu0 }
 0x152   :  { %v813_v5 = vadd.f32 %v1121_v63, %v773_v59  ;;  %v1145_v6 = vpop.f32.mrb[7].mxu1 }
 0x154   :  { %v853_v7 = vadd.f32 %v1143_v2, %v813_v5 }
 0x156   :  { %v858_v8 = vmax.f32 %v853_v7, 0.0 }
 0x158   :  { %v860_v9 = vpack.c.bf16 %v858_v8, %v858_v8 }
 0x15a   :  { %1173 = vmatmul.mubr.bf16.vlgmr.msra.gmra.mrb[8].mxu0 %v860_v9 }
 0x22d   :  { %v959_v11 = vpop.f32.mrb[8].mxu0 }
 0x22e   :  { %v965_v12 = vadd.f32 %v985_v10, %v959_v11  ;;  %v1174_v13 = vpop.f32.mrb[9].mxu0 }
 0x22f   :  { %v962_v14 = vpop.f32.mrb[10].mxu0 }
 0x230   :  { %966 = vst [vmem:[#allocation8] sm:$0xff] %v965_v12  ;;  %v1175_v15 = vpop.f32.mrb[11].mxu0 }
 0x231   :  { %971 = vsyncadd [#allocation4], 96  ;;  %s1377_s9 = smov [#allocation8]  }
 0x232   :  { %s972_s10 = sshll.u32 %s1377_s9, 4  ;;  %s973_s10 = int_to_ptr.vmem [resolvable:$true] %s972_s10 }
 0x233   :  { %s1339_s11 = scalar_lea.vmem %s973_s10, 32  ;;  %s1343_s12 = scalar_lea.vmem %s973_s10, 128 }
 0x234   :  { %p1340_p10 = scmp.ne.s32.totalorder %s973_s10, %s1339_s11  ;;  %p1344_p11 = scmp.lt.s32.totalorder %s973_s10, %s973_s10 }
 0x235   :  { %p1345_p12 = scmp.lt.s32.totalorder %s1343_s12, %s1339_s11 }
 0x237   :  { %p1346_p13 = por %p1345_p12, %p1344_p11 }
 0x239   :  { %p1347_p0 = pnand %p1346_p13, %p1340_p10 }
 0x23b   :  { %1350 = shalt.err (!%p1347_p0)
}
 0x23c   :  { %s1351_s14 = scalar_lea.hbm %s1485_s5, 32 }
 0x23d   :  { %p1352_p1 = scmp.ne.s32.totalorder %s1485_s5, %s1351_s14  ;;  %p1355_p2 = scmp.lt.u32.totalorder %s1351_s14, %s1485_s5 }
 0x23f   :  { %p1357_p3 = pnand %p1355_p2, %p1352_p1 }
 0x241   :  { %1360 = shalt.err (!%p1357_p3)
}
 0x242   :  { %s1378_s18 = smov 32   ;;  %s1379_s19 = smov 2  }
 0x243   :  { %978 = dma.vmem_to_hbm [thread:$0]  %s973_s10, 32, %s1485_s5, [#allocation4], %s1378_s18, %s1378_s18, %s1379_s19  }
 0x244   :  { %1365 = dma.done.wait [#allocation4], 128  }
 0x245   :  { %1366 = vsyncadd [#allocation4], 4294967168 }
 0x246   :  { %982 = vsyncpa [#allocation3], 1 }
 0x247   :  { %983 = vsyncpa [#allocation6], 1 }
 0x248   :  { %984 = vsyncpa [#allocation4], 1 }

</bundles_post_ra>
